<compile_context>
chip_gen: v6e
topology: v6e:2x2x1
jax: 0.10.0
libtpu: 0.0.40
codegen_flags: <defaults>
</compile_context>

<pallas_src>
import functools

import jax
import jax.numpy as jnp
import numpy as np
from jax.experimental import pallas as pl
from jax.experimental.pallas import tpu as pltpu

# Global the original PyTorch code references (indices into the feature axis).
categorical_features_indices = [2, 3]

LANE = 128                      # lanes per vreg row (presence vector width)
SUB = 8                         # sublanes per vreg (accumulator padded to 8 rows)
NCORE = 2                       # 'parallel' grid axis: 2 TCs on v7x, harmless on v5e/v6e
_PAD_SENTINEL = -2.0            # int(-2.0) + 1 == -1 -> matches no class index >= 0
_DEFAULT_BLOCK_BYTES = 2 << 20  # ~2 MiB x-block; 2x double-buffered stays tiny in VMEM


def _cdiv(a, b):
    return -(-a // b)


def _round_up(a, b):
    return _cdiv(a, b) * b


# ---------------------------------------------------------------------------
# Pallas kernel: fused class-presence scan for ALL categorical columns.
#   x_ref   : (n_cat, TNP, 128) float32  lane/sublane-dense categorical values
#   out_ref : (1, 8, 128)       float32  per-core accumulator;
#             out[0, ci, v] == 1 iff class v (== value + 1) appears for
#             categorical column ci in any tile processed so far by this core.
# ---------------------------------------------------------------------------
def _presence_kernel(x_ref, out_ref, *, k1s):
    n_cat = len(k1s)

    @pl.when(pl.program_id(1) == 0)
    def _():
        out_ref[...] = jnp.zeros_like(out_ref)

    lane = jax.lax.broadcasted_iota(jnp.int32, (1, LANE), 1)        # (1, 128)

    rows = []
    for ci in range(n_cat):                                         # static unroll
        # Load one column's tile and shift: trunc-toward-zero matches .long().
        xci = x_ref[ci].astype(jnp.int32) + 1                       # (TNP, 128)
        # Layout-preserving regroup so the per-class fold along axis 0 is pure
        # vreg-wise VPU max (no tile-sized XLU reduction).
        xci = xci.reshape(-1, SUB, LANE)                            # (TNP//8, 8, 128)
        row = jnp.zeros((1, LANE), jnp.float32)
        for v in range(k1s[ci]):                                    # K1 small, static
            m8 = jnp.max(jnp.where(xci == v, 1.0, 0.0), axis=0)     # (8,128) VPU fold
            hit = jnp.max(m8)                                       # 1-vreg XLU reduce
            row = jnp.maximum(row, jnp.where(lane == v, hit, 0.0))  # tiny select
        rows.append(row)
    if n_cat < SUB:
        rows.append(jnp.zeros((SUB - n_cat, LANE), jnp.float32))
    new = jnp.concatenate(rows, axis=0)[None]                       # (1, 8, 128)
    out_ref[...] = jnp.maximum(out_ref[...], new)                   # dense vst


def _plan(num_rows, n_cat, target_block_bytes):
    """Pick the tile height (in 128-lane rows) and blocks-per-core."""
    np_min = max(1, _cdiv(num_rows, LANE))                 # 128-lane rows needed
    tnp_target = max(SUB, (target_block_bytes // (n_cat * LANE * 4)) // SUB * SUB)
    tnp = min(tnp_target, _round_up(np_min, SUB))          # multiple of 8
    bpc = _cdiv(np_min, tnp * NCORE)                        # blocks per core
    np_total = NCORE * bpc * tnp                            # padded row count
    return tnp, bpc, np_total


@functools.partial(jax.jit,
                   static_argnames=("cat_inds", "k1s", "target_block_bytes"))
def categorical_presence(x, *, cat_inds, k1s,
                         target_block_bytes=_DEFAULT_BLOCK_BYTES):
    """x: (B, S, F) f32 -> (8, 128) f32 presence matrix.

    Row ci, lane v == 1 iff class v (== x[..., cat_inds[ci]] + 1) appears
    anywhere in (B, S)."""
    B, S, _ = x.shape
    n_cat = len(cat_inds)
    assert n_cat <= SUB and max(k1s) <= LANE
    R = B * S
    tnp, bpc, np_total = _plan(R, n_cat, target_block_bytes)
    RP = np_total * LANE

    # Gather ONLY the categorical columns into a lane/sublane-dense slab.
    # Padding uses a sentinel that maps to class -1 (matches no class), so the
    # kernel needs no tail masking and every grid block is fully in-bounds.
    cols = []
    for ind in cat_inds:
        col = x[..., ind].reshape(R)
        col = jnp.pad(col, (0, RP - R), constant_values=_PAD_SENTINEL)
        cols.append(col.reshape(np_total, LANE))
    xc = jnp.stack(cols, axis=0)                            # (n_cat, NP, 128)

    kernel = functools.partial(_presence_kernel, k1s=k1s)
    out = pl.pallas_call(
        kernel,
        out_shape=jax.ShapeDtypeStruct((NCORE, SUB, LANE), jnp.float32),
        grid=(NCORE, bpc),
        in_specs=[pl.BlockSpec((n_cat, tnp, LANE),
                               lambda c, b: (0, c * bpc + b, 0))],
        out_specs=pl.BlockSpec((1, SUB, LANE), lambda c, b: (c, 0, 0)),
        compiler_params=pltpu.CompilerParams(
            dimension_semantics=("parallel", "arbitrary")),
    )(xc)
    return jnp.max(out, axis=0)                             # combine per-core accs


# ---------------------------------------------------------------------------
# Model wrapper (mirrors baseline_model).
# ---------------------------------------------------------------------------
class BaselineModelPallas:
    def __init__(self, input_dim, hidden_dim, output_dim, ids, key):
        self.ids = list(ids.values())
        # nn.Linear(input_dim, hidden_dim): deterministically initialized but
        # (exactly like the PyTorch forward) never used in forward().
        kw, kb = jax.random.split(key)
        bound = 1.0 / np.sqrt(input_dim)
        self.linear_w = jax.random.uniform(
            kw, (hidden_dim, input_dim), jnp.float32, -bound, bound)
        self.linear_b = jax.random.uniform(
            kb, (hidden_dim,), jnp.float32, -bound, bound)

    def forward(self, x, target_block_bytes=_DEFAULT_BLOCK_BYTES):
        B, S, _ = x.shape
        cat_inds = tuple(categorical_features_indices)
        k1s = tuple(len(v) + 1 for v in self.ids)
        pres = categorical_presence(
            x, cat_inds=cat_inds, k1s=k1s,
            target_block_bytes=target_block_bytes)          # (8, 128)
        # NOTE (perf): materializing these (B, S, K1) broadcasts writes more
        # HBM bytes than the kernel reads; they are a pure replication of K1
        # numbers and are kept lazy here.  Consumers that only need the class
        # presence can read pres[i, :K1] directly.
        c = [jnp.broadcast_to(pres[i, :K1].reshape(1, 1, K1), (B, S, K1))
             for i, K1 in enumerate(k1s)]
        return (x, x, c)


# ---------------------------------------------------------------------------
# Pure-JAX reference for validation (same literal semantics).
# ---------------------------------------------------------------------------
def ref_forward(x, ids_lists):
    c = []
    for i, ind in enumerate(categorical_features_indices):
        K1 = len(ids_lists[i]) + 1
        idx = x[:, :, ind].astype(jnp.int32) + 1
        onehot = jax.nn.one_hot(idx, K1, dtype=jnp.float32)        # (B, S, K1)
        presence = jnp.max(onehot, axis=(0, 1))                    # (K1,)
        c.append(jnp.broadcast_to(presence, (x.shape[0], x.shape[1], K1)))
    return (x, x, c)


if __name__ == "__main__":
    ids = {"cat_a": [10, 20, 30], "cat_b": [1, 2, 3, 4, 5]}   # K = 3 and 5
    input_dim, hidden_dim, output_dim = 4, 32, 4
    model = BaselineModelPallas(input_dim, hidden_dim, output_dim, ids,
                                jax.random.PRNGKey(1))

    def make_x(seed, B, S):
        k1, k2, k3 = jax.random.split(jax.random.PRNGKey(seed), 3)
        x_cont = jax.random.normal(k1, (B, S, 2), dtype=jnp.float32)
        cat0 = jax.random.randint(
            k2, (B, S, 1), -1, len(ids["cat_a"])).astype(jnp.float32)
        cat1 = jax.random.randint(
            k3, (B, S, 1), -1, len(ids["cat_b"])).astype(jnp.float32)
        return jnp.concatenate([x_cont, cat0, cat1], axis=-1)      # (B, S, 4)

    def check(x, **kw):
        x0, x1, c = model.forward(x, **kw)
        jax.block_until_ready((x0, x1, c))
        rx0, rx1, rc = ref_forward(x, model.ids)
        assert np.allclose(np.asarray(x0), np.asarray(rx0))
        assert np.allclose(np.asarray(x1), np.asarray(rx1))
        for got, want in zip(c, rc):
            assert got.shape == want.shape and got.dtype == jnp.float32
            assert np.allclose(np.asarray(got), np.asarray(want))

    # Small shape consistent with the module (batch=2, seq=8, features=4).
    check(make_x(0, 2, 8))
    # Larger input with a tiny block override so the multi-step accumulation
    # path (grid = (2, >1)) and both 'core' slots see real data.
    check(make_x(2, 16, 1000), target_block_bytes=8192)

    print("KERNEL_OK")
</pallas_src>

<mosaic_0001>
module attributes {stable_mosaic.version = 11 : i64} {
  func.func @_presence_kernel(%arg0: i32, %arg1: i32, %arg2: memref<2x8x128xf32, #tpu.memory_space<vmem>>, %arg3: memref<1x8x128xf32, #tpu.memory_space<vmem>>) attributes {dimension_semantics = [#tpu.dimension_semantics<parallel>, #tpu.dimension_semantics<arbitrary>], iteration_bounds = array<i64: 2, 1>, scalar_prefetch = 0 : i64, scratch_operands = 0 : i64, tpu.core_type = #tpu.core_type<tc>, window_params = [{transform_indices = @transform_0, window_bounds = array<i64: 2, 8, 128>}, {transform_indices = @transform_1, window_bounds = array<i64: 1, 8, 128>}]} {
    %c0_i32 = arith.constant 0 : i32
    %0 = arith.cmpi eq, %arg1, %c0_i32 : i32
    %1 = arith.extui %0 : i1 to i32
    %c0_i32_0 = arith.constant 0 : i32
    %2 = arith.cmpi ne, %1, %c0_i32_0 : i32
    scf.if %2 {
      %cst_80 = arith.constant 0.000000e+00 : f32
      %184 = vector.broadcast %cst_80 : f32 to vector<1x8x128xf32>
      %c0_81 = arith.constant 0 : index
      %c0_82 = arith.constant 0 : index
      %c0_83 = arith.constant 0 : index
      %185 = vector.load %arg3[%c0_81, %c0_82, %c0_83] : memref<1x8x128xf32, #tpu.memory_space<vmem>>, vector<1x8x128xf32>
      tpu.vector_store %arg3[%c0_81, %c0_82, %c0_83], %184 {strides = array<i32>} : memref<1x8x128xf32, #tpu.memory_space<vmem>>, vector<1x8x128xf32>,
    } else {
    }
    %3 = tpu.iota {dimensions = array<i32: 1>} : vector<1x128xi32>
    %c0 = arith.constant 0 : index
    %c0_1 = arith.constant 0 : index
    %c0_2 = arith.constant 0 : index
    %4 = vector.load %arg2[%c0, %c0_1, %c0_2] : memref<2x8x128xf32, #tpu.memory_space<vmem>>, vector<1x8x128xf32>
    %5 = vector.shape_cast %4 : vector<1x8x128xf32> to vector<8x128xf32>
    %6 = arith.fptosi %5 : vector<8x128xf32> to vector<8x128xi32>
    %c1_i32 = arith.constant 1 : i32
    %7 = vector.broadcast %c1_i32 : i32 to vector<8x128xi32>
    %8 = arith.addi %6, %7 : vector<8x128xi32>
    %9 = vector.shape_cast %8 : vector<8x128xi32> to vector<1x8x128xi32>
    %cst = arith.constant 0.000000e+00 : f32
    %10 = vector.broadcast %cst : f32 to vector<1x128xf32>
    %c0_i32_3 = arith.constant 0 : i32
    %11 = vector.broadcast %c0_i32_3 : i32 to vector<1x8x128xi32>
    %12 = arith.cmpi eq, %9, %11 : vector<1x8x128xi32>
    %cst_4 = arith.constant 1.000000e+00 : f32
    %cst_5 = arith.constant 0.000000e+00 : f32
    %13 = vector.broadcast %cst_4 : f32 to vector<1x8x128xf32>
    %14 = vector.broadcast %cst_5 : f32 to vector<1x8x128xf32>
    %15 = arith.select %12, %13, %14 : vector<1x8x128xi1>, vector<1x8x128xf32>
    %cst_6 = arith.constant dense<0xFF800000> : vector<8x128xf32>
    %16 = vector.multi_reduction <maximumf>, %15, %cst_6 [0] : vector<1x8x128xf32> to vector<8x128xf32>
    %17 = vector.shape_cast %16 : vector<8x128xf32> to vector<1x8x128xf32>
    %cst_7 = arith.constant dense<0xFF800000> : vector<1xf32>
    %18 = vector.multi_reduction <maximumf>, %17, %cst_7 [1, 2] : vector<1x8x128xf32> to vector<1xf32>
    %19 = vector.shape_cast %18 : vector<1xf32> to vector<1x1x1xf32>
    %20 = vector.extract %19[0, 0, 0] : f32 from vector<1x1x1xf32>
    %c0_i32_8 = arith.constant 0 : i32
    %21 = vector.broadcast %c0_i32_8 : i32 to vector<1x128xi32>
    %22 = arith.cmpi eq, %3, %21 : vector<1x128xi32>
    %cst_9 = arith.constant 0.000000e+00 : f32
    %23 = vector.broadcast %20 : f32 to vector<1x128xf32>
    %24 = vector.broadcast %cst_9 : f32 to vector<1x128xf32>
    %25 = arith.select %22, %23, %24 : vector<1x128xi1>, vector<1x128xf32>
    %26 = arith.maximumf %10, %25 : vector<1x128xf32>
    %c1_i32_10 = arith.constant 1 : i32
    %27 = vector.broadcast %c1_i32_10 : i32 to vector<1x8x128xi32>
    %28 = arith.cmpi eq, %9, %27 : vector<1x8x128xi32>
    %cst_11 = arith.constant 1.000000e+00 : f32
    %cst_12 = arith.constant 0.000000e+00 : f32
    %29 = vector.broadcast %cst_11 : f32 to vector<1x8x128xf32>
    %30 = vector.broadcast %cst_12 : f32 to vector<1x8x128xf32>
    %31 = arith.select %28, %29, %30 : vector<1x8x128xi1>, vector<1x8x128xf32>
    %cst_13 = arith.constant dense<0xFF800000> : vector<8x128xf32>
    %32 = vector.multi_reduction <maximumf>, %31, %cst_13 [0] : vector<1x8x128xf32> to vector<8x128xf32>
    %33 = vector.shape_cast %32 : vector<8x128xf32> to vector<1x8x128xf32>
    %cst_14 = arith.constant dense<0xFF800000> : vector<1xf32>
    %34 = vector.multi_reduction <maximumf>, %33, %cst_14 [1, 2] : vector<1x8x128xf32> to vector<1xf32>
    %35 = vector.shape_cast %34 : vector<1xf32> to vector<1x1x1xf32>
    %36 = vector.extract %35[0, 0, 0] : f32 from vector<1x1x1xf32>
    %c1_i32_15 = arith.constant 1 : i32
    %37 = vector.broadcast %c1_i32_15 : i32 to vector<1x128xi32>
    %38 = arith.cmpi eq, %3, %37 : vector<1x128xi32>
    %cst_16 = arith.constant 0.000000e+00 : f32
    %39 = vector.broadcast %36 : f32 to vector<1x128xf32>
    %40 = vector.broadcast %cst_16 : f32 to vector<1x128xf32>
    %41 = arith.select %38, %39, %40 : vector<1x128xi1>, vector<1x128xf32>
    %42 = arith.maximumf %26, %41 : vector<1x128xf32>
    %c2_i32 = arith.constant 2 : i32
    %43 = vector.broadcast %c2_i32 : i32 to vector<1x8x128xi32>
    %44 = arith.cmpi eq, %9, %43 : vector<1x8x128xi32>
    %cst_17 = arith.constant 1.000000e+00 : f32
    %cst_18 = arith.constant 0.000000e+00 : f32
    %45 = vector.broadcast %cst_17 : f32 to vector<1x8x128xf32>
    %46 = vector.broadcast %cst_18 : f32 to vector<1x8x128xf32>
    %47 = arith.select %44, %45, %46 : vector<1x8x128xi1>, vector<1x8x128xf32>
    %cst_19 = arith.constant dense<0xFF800000> : vector<8x128xf32>
    %48 = vector.multi_reduction <maximumf>, %47, %cst_19 [0] : vector<1x8x128xf32> to vector<8x128xf32>
    %49 = vector.shape_cast %48 : vector<8x128xf32> to vector<1x8x128xf32>
    %cst_20 = arith.constant dense<0xFF800000> : vector<1xf32>
    %50 = vector.multi_reduction <maximumf>, %49, %cst_20 [1, 2] : vector<1x8x128xf32> to vector<1xf32>
    %51 = vector.shape_cast %50 : vector<1xf32> to vector<1x1x1xf32>
    %52 = vector.extract %51[0, 0, 0] : f32 from vector<1x1x1xf32>
    %c2_i32_21 = arith.constant 2 : i32
    %53 = vector.broadcast %c2_i32_21 : i32 to vector<1x128xi32>
    %54 = arith.cmpi eq, %3, %53 : vector<1x128xi32>
    %cst_22 = arith.constant 0.000000e+00 : f32
    %55 = vector.broadcast %52 : f32 to vector<1x128xf32>
    %56 = vector.broadcast %cst_22 : f32 to vector<1x128xf32>
    %57 = arith.select %54, %55, %56 : vector<1x128xi1>, vector<1x128xf32>
    %58 = arith.maximumf %42, %57 : vector<1x128xf32>
    %c3_i32 = arith.constant 3 : i32
    %59 = vector.broadcast %c3_i32 : i32 to vector<1x8x128xi32>
    %60 = arith.cmpi eq, %9, %59 : vector<1x8x128xi32>
    %cst_23 = arith.constant 1.000000e+00 : f32
    %cst_24 = arith.constant 0.000000e+00 : f32
    %61 = vector.broadcast %cst_23 : f32 to vector<1x8x128xf32>
    %62 = vector.broadcast %cst_24 : f32 to vector<1x8x128xf32>
    %63 = arith.select %60, %61, %62 : vector<1x8x128xi1>, vector<1x8x128xf32>
    %cst_25 = arith.constant dense<0xFF800000> : vector<8x128xf32>
    %64 = vector.multi_reduction <maximumf>, %63, %cst_25 [0] : vector<1x8x128xf32> to vector<8x128xf32>
    %65 = vector.shape_cast %64 : vector<8x128xf32> to vector<1x8x128xf32>
    %cst_26 = arith.constant dense<0xFF800000> : vector<1xf32>
    %66 = vector.multi_reduction <maximumf>, %65, %cst_26 [1, 2] : vector<1x8x128xf32> to vector<1xf32>
    %67 = vector.shape_cast %66 : vector<1xf32> to vector<1x1x1xf32>
    %68 = vector.extract %67[0, 0, 0] : f32 from vector<1x1x1xf32>
    %c3_i32_27 = arith.constant 3 : i32
    %69 = vector.broadcast %c3_i32_27 : i32 to vector<1x128xi32>
    %70 = arith.cmpi eq, %3, %69 : vector<1x128xi32>
    %cst_28 = arith.constant 0.000000e+00 : f32
    %71 = vector.broadcast %68 : f32 to vector<1x128xf32>
    %72 = vector.broadcast %cst_28 : f32 to vector<1x128xf32>
    %73 = arith.select %70, %71, %72 : vector<1x128xi1>, vector<1x128xf32>
    %74 = arith.maximumf %58, %73 : vector<1x128xf32>
    %c1 = arith.constant 1 : index
    %c0_29 = arith.constant 0 : index
    %c0_30 = arith.constant 0 : index
    %75 = vector.load %arg2[%c1, %c0_29, %c0_30] : memref<2x8x128xf32, #tpu.memory_space<vmem>>, vector<1x8x128xf32>
    %76 = vector.shape_cast %75 : vector<1x8x128xf32> to vector<8x128xf32>
    %77 = arith.fptosi %76 : vector<8x128xf32> to vector<8x128xi32>
    %c1_i32_31 = arith.constant 1 : i32
    %78 = vector.broadcast %c1_i32_31 : i32 to vector<8x128xi32>
    %79 = arith.addi %77, %78 : vector<8x128xi32>
    %80 = vector.shape_cast %79 : vector<8x128xi32> to vector<1x8x128xi32>
    %cst_32 = arith.constant 0.000000e+00 : f32
    %81 = vector.broadcast %cst_32 : f32 to vector<1x128xf32>
    %c0_i32_33 = arith.constant 0 : i32
    %82 = vector.broadcast %c0_i32_33 : i32 to vector<1x8x128xi32>
    %83 = arith.cmpi eq, %80, %82 : vector<1x8x128xi32>
    %cst_34 = arith.constant 1.000000e+00 : f32
    %cst_35 = arith.constant 0.000000e+00 : f32
    %84 = vector.broadcast %cst_34 : f32 to vector<1x8x128xf32>
    %85 = vector.broadcast %cst_35 : f32 to vector<1x8x128xf32>
    %86 = arith.select %83, %84, %85 : vector<1x8x128xi1>, vector<1x8x128xf32>
    %cst_36 = arith.constant dense<0xFF800000> : vector<8x128xf32>
    %87 = vector.multi_reduction <maximumf>, %86, %cst_36 [0] : vector<1x8x128xf32> to vector<8x128xf32>
    %88 = vector.shape_cast %87 : vector<8x128xf32> to vector<1x8x128xf32>
    %cst_37 = arith.constant dense<0xFF800000> : vector<1xf32>
    %89 = vector.multi_reduction <maximumf>, %88, %cst_37 [1, 2] : vector<1x8x128xf32> to vector<1xf32>
    %90 = vector.shape_cast %89 : vector<1xf32> to vector<1x1x1xf32>
    %91 = vector.extract %90[0, 0, 0] : f32 from vector<1x1x1xf32>
    %c0_i32_38 = arith.constant 0 : i32
    %92 = vector.broadcast %c0_i32_38 : i32 to vector<1x128xi32>
    %93 = arith.cmpi eq, %3, %92 : vector<1x128xi32>
    %cst_39 = arith.constant 0.000000e+00 : f32
    %94 = vector.broadcast %91 : f32 to vector<1x128xf32>
    %95 = vector.broadcast %cst_39 : f32 to vector<1x128xf32>
    %96 = arith.select %93, %94, %95 : vector<1x128xi1>, vector<1x128xf32>
    %97 = arith.maximumf %81, %96 : vector<1x128xf32>
    %c1_i32_40 = arith.constant 1 : i32
    %98 = vector.broadcast %c1_i32_40 : i32 to vector<1x8x128xi32>
    %99 = arith.cmpi eq, %80, %98 : vector<1x8x128xi32>
    %cst_41 = arith.constant 1.000000e+00 : f32
    %cst_42 = arith.constant 0.000000e+00 : f32
    %100 = vector.broadcast %cst_41 : f32 to vector<1x8x128xf32>
    %101 = vector.broadcast %cst_42 : f32 to vector<1x8x128xf32>
    %102 = arith.select %99, %100, %101 : vector<1x8x128xi1>, vector<1x8x128xf32>
    %cst_43 = arith.constant dense<0xFF800000> : vector<8x128xf32>
    %103 = vector.multi_reduction <maximumf>, %102, %cst_43 [0] : vector<1x8x128xf32> to vector<8x128xf32>
    %104 = vector.shape_cast %103 : vector<8x128xf32> to vector<1x8x128xf32>
    %cst_44 = arith.constant dense<0xFF800000> : vector<1xf32>
    %105 = vector.multi_reduction <maximumf>, %104, %cst_44 [1, 2] : vector<1x8x128xf32> to vector<1xf32>
    %106 = vector.shape_cast %105 : vector<1xf32> to vector<1x1x1xf32>
    %107 = vector.extract %106[0, 0, 0] : f32 from vector<1x1x1xf32>
    %c1_i32_45 = arith.constant 1 : i32
    %108 = vector.broadcast %c1_i32_45 : i32 to vector<1x128xi32>
    %109 = arith.cmpi eq, %3, %108 : vector<1x128xi32>
    %cst_46 = arith.constant 0.000000e+00 : f32
    %110 = vector.broadcast %107 : f32 to vector<1x128xf32>
    %111 = vector.broadcast %cst_46 : f32 to vector<1x128xf32>
    %112 = arith.select %109, %110, %111 : vector<1x128xi1>, vector<1x128xf32>
    %113 = arith.maximumf %97, %112 : vector<1x128xf32>
    %c2_i32_47 = arith.constant 2 : i32
    %114 = vector.broadcast %c2_i32_47 : i32 to vector<1x8x128xi32>
    %115 = arith.cmpi eq, %80, %114 : vector<1x8x128xi32>
    %cst_48 = arith.constant 1.000000e+00 : f32
    %cst_49 = arith.constant 0.000000e+00 : f32
    %116 = vector.broadcast %cst_48 : f32 to vector<1x8x128xf32>
    %117 = vector.broadcast %cst_49 : f32 to vector<1x8x128xf32>
    %118 = arith.select %115, %116, %117 : vector<1x8x128xi1>, vector<1x8x128xf32>
    %cst_50 = arith.constant dense<0xFF800000> : vector<8x128xf32>
    %119 = vector.multi_reduction <maximumf>, %118, %cst_50 [0] : vector<1x8x128xf32> to vector<8x128xf32>
    %120 = vector.shape_cast %119 : vector<8x128xf32> to vector<1x8x128xf32>
    %cst_51 = arith.constant dense<0xFF800000> : vector<1xf32>
    %121 = vector.multi_reduction <maximumf>, %120, %cst_51 [1, 2] : vector<1x8x128xf32> to vector<1xf32>
    %122 = vector.shape_cast %121 : vector<1xf32> to vector<1x1x1xf32>
    %123 = vector.extract %122[0, 0, 0] : f32 from vector<1x1x1xf32>
    %c2_i32_52 = arith.constant 2 : i32
    %124 = vector.broadcast %c2_i32_52 : i32 to vector<1x128xi32>
    %125 = arith.cmpi eq, %3, %124 : vector<1x128xi32>
    %cst_53 = arith.constant 0.000000e+00 : f32
    %126 = vector.broadcast %123 : f32 to vector<1x128xf32>
    %127 = vector.broadcast %cst_53 : f32 to vector<1x128xf32>
    %128 = arith.select %125, %126, %127 : vector<1x128xi1>, vector<1x128xf32>
    %129 = arith.maximumf %113, %128 : vector<1x128xf32>
    %c3_i32_54 = arith.constant 3 : i32
    %130 = vector.broadcast %c3_i32_54 : i32 to vector<1x8x128xi32>
    %131 = arith.cmpi eq, %80, %130 : vector<1x8x128xi32>
    %cst_55 = arith.constant 1.000000e+00 : f32
    %cst_56 = arith.constant 0.000000e+00 : f32
    %132 = vector.broadcast %cst_55 : f32 to vector<1x8x128xf32>
    %133 = vector.broadcast %cst_56 : f32 to vector<1x8x128xf32>
    %134 = arith.select %131, %132, %133 : vector<1x8x128xi1>, vector<1x8x128xf32>
    %cst_57 = arith.constant dense<0xFF800000> : vector<8x128xf32>
    %135 = vector.multi_reduction <maximumf>, %134, %cst_57 [0] : vector<1x8x128xf32> to vector<8x128xf32>
    %136 = vector.shape_cast %135 : vector<8x128xf32> to vector<1x8x128xf32>
    %cst_58 = arith.constant dense<0xFF800000> : vector<1xf32>
    %137 = vector.multi_reduction <maximumf>, %136, %cst_58 [1, 2] : vector<1x8x128xf32> to vector<1xf32>
    %138 = vector.shape_cast %137 : vector<1xf32> to vector<1x1x1xf32>
    %139 = vector.extract %138[0, 0, 0] : f32 from vector<1x1x1xf32>
    %c3_i32_59 = arith.constant 3 : i32
    %140 = vector.broadcast %c3_i32_59 : i32 to vector<1x128xi32>
    %141 = arith.cmpi eq, %3, %140 : vector<1x128xi32>
    %cst_60 = arith.constant 0.000000e+00 : f32
    %142 = vector.broadcast %139 : f32 to vector<1x128xf32>
    %143 = vector.broadcast %cst_60 : f32 to vector<1x128xf32>
    %144 = arith.select %141, %142, %143 : vector<1x128xi1>, vector<1x128xf32>
    %145 = arith.maximumf %129, %144 : vector<1x128xf32>
    %c4_i32 = arith.constant 4 : i32
    %146 = vector.broadcast %c4_i32 : i32 to vector<1x8x128xi32>
    %147 = arith.cmpi eq, %80, %146 : vector<1x8x128xi32>
    %cst_61 = arith.constant 1.000000e+00 : f32
    %cst_62 = arith.constant 0.000000e+00 : f32
    %148 = vector.broadcast %cst_61 : f32 to vector<1x8x128xf32>
    %149 = vector.broadcast %cst_62 : f32 to vector<1x8x128xf32>
    %150 = arith.select %147, %148, %149 : vector<1x8x128xi1>, vector<1x8x128xf32>
    %cst_63 = arith.constant dense<0xFF800000> : vector<8x128xf32>
    %151 = vector.multi_reduction <maximumf>, %150, %cst_63 [0] : vector<1x8x128xf32> to vector<8x128xf32>
    %152 = vector.shape_cast %151 : vector<8x128xf32> to vector<1x8x128xf32>
    %cst_64 = arith.constant dense<0xFF800000> : vector<1xf32>
    %153 = vector.multi_reduction <maximumf>, %152, %cst_64 [1, 2] : vector<1x8x128xf32> to vector<1xf32>
    %154 = vector.shape_cast %153 : vector<1xf32> to vector<1x1x1xf32>
    %155 = vector.extract %154[0, 0, 0] : f32 from vector<1x1x1xf32>
    %c4_i32_65 = arith.constant 4 : i32
    %156 = vector.broadcast %c4_i32_65 : i32 to vector<1x128xi32>
    %157 = arith.cmpi eq, %3, %156 : vector<1x128xi32>
    %cst_66 = arith.constant 0.000000e+00 : f32
    %158 = vector.broadcast %155 : f32 to vector<1x128xf32>
    %159 = vector.broadcast %cst_66 : f32 to vector<1x128xf32>
    %160 = arith.select %157, %158, %159 : vector<1x128xi1>, vector<1x128xf32>
    %161 = arith.maximumf %145, %160 : vector<1x128xf32>
    %c5_i32 = arith.constant 5 : i32
    %162 = vector.broadcast %c5_i32 : i32 to vector<1x8x128xi32>
    %163 = arith.cmpi eq, %80, %162 : vector<1x8x128xi32>
    %cst_67 = arith.constant 1.000000e+00 : f32
    %cst_68 = arith.constant 0.000000e+00 : f32
    %164 = vector.broadcast %cst_67 : f32 to vector<1x8x128xf32>
    %165 = vector.broadcast %cst_68 : f32 to vector<1x8x128xf32>
    %166 = arith.select %163, %164, %165 : vector<1x8x128xi1>, vector<1x8x128xf32>
    %cst_69 = arith.constant dense<0xFF800000> : vector<8x128xf32>
    %167 = vector.multi_reduction <maximumf>, %166, %cst_69 [0] : vector<1x8x128xf32> to vector<8x128xf32>
    %168 = vector.shape_cast %167 : vector<8x128xf32> to vector<1x8x128xf32>
    %cst_70 = arith.constant dense<0xFF800000> : vector<1xf32>
    %169 = vector.multi_reduction <maximumf>, %168, %cst_70 [1, 2] : vector<1x8x128xf32> to vector<1xf32>
    %170 = vector.shape_cast %169 : vector<1xf32> to vector<1x1x1xf32>
    %171 = vector.extract %170[0, 0, 0] : f32 from vector<1x1x1xf32>
    %c5_i32_71 = arith.constant 5 : i32
    %172 = vector.broadcast %c5_i32_71 : i32 to vector<1x128xi32>
    %173 = arith.cmpi eq, %3, %172 : vector<1x128xi32>
    %cst_72 = arith.constant 0.000000e+00 : f32
    %174 = vector.broadcast %171 : f32 to vector<1x128xf32>
    %175 = vector.broadcast %cst_72 : f32 to vector<1x128xf32>
    %176 = arith.select %173, %174, %175 : vector<1x128xi1>, vector<1x128xf32>
    %177 = arith.maximumf %161, %176 : vector<1x128xf32>
    %cst_73 = arith.constant 0.000000e+00 : f32
    %178 = vector.broadcast %cst_73 : f32 to vector<6x128xf32>
    %179 = tpu.concatenate %74, %177, %178 in 0 : vector<1x128xf32>, vector<1x128xf32>, vector<6x128xf32> -> vector<8x128xf32>
    %180 = vector.shape_cast %179 : vector<8x128xf32> to vector<1x8x128xf32>
    %c0_74 = arith.constant 0 : index
    %c0_75 = arith.constant 0 : index
    %c0_76 = arith.constant 0 : index
    %181 = vector.load %arg3[%c0_74, %c0_75, %c0_76] : memref<1x8x128xf32, #tpu.memory_space<vmem>>, vector<1x8x128xf32>
    %182 = arith.maximumf %181, %180 : vector<1x8x128xf32>
    %c0_77 = arith.constant 0 : index
    %c0_78 = arith.constant 0 : index
    %c0_79 = arith.constant 0 : index
    %183 = vector.load %arg3[%c0_77, %c0_78, %c0_79] : memref<1x8x128xf32, #tpu.memory_space<vmem>>, vector<1x8x128xf32>
    tpu.vector_store %arg3[%c0_77, %c0_78, %c0_79], %182 {strides = array<i32>} : memref<1x8x128xf32, #tpu.memory_space<vmem>>, vector<1x8x128xf32>,
    return
  }
  func.func @transform_0(%arg0: i32, %arg1: i32) -> (i32, i32, i32) {
    %c1_i32 = arith.constant 1 : i32
    %0 = arith.muli %arg0, %c1_i32 : i32
    %1 = arith.addi %0, %arg1 : i32
    %c0_i32 = arith.constant 0 : i32
    %c0_i32_0 = arith.constant 0 : i32
    %c0_i32_1 = arith.constant 0 : i32
    return %c0_i32, %1, %c0_i32_0 : i32, i32, i32
  }
  func.func @transform_1(%arg0: i32, %arg1: i32) -> (i32, i32, i32) {
    %c0_i32 = arith.constant 0 : i32
    %c0_i32_0 = arith.constant 0 : i32
    %c0_i32_1 = arith.constant 0 : i32
    return %arg0, %c0_i32, %c0_i32_0 : i32, i32, i32
  }
}

</mosaic_0001>

<bundles_post_ra>
// kernel: squeeze.2
= control target key start
LH: loop header
LB: loop body
LE: loop exit
PB: predicated region body
PF: predicated region fallthrough
CT: control target
= control target key end

     0   :  { %vm8_vm0 = vcmask 64512   ;;  %vm14_vm1 = vcmask 130112   ;;  %s42_s0 = inlined_call_operand.vmem [shape: f32[2,8], index: 0, kind: input, shape index: {}]   ;;  %s43_s1 = inlined_call_operand.vmem [shape: f32[16], index: 1, kind: output, shape index: {}]  }
   0x1   :  { %v5_v0 = vld [vmem:[%s42_s0] sm:$0x3]  ;;  %s25_s0 = smov 8  }
   0x2   :  { %6 = vst [vmem:[#allocation1] sm:$0x3] %v5_v0 }
   0x9   :  { %v11_v1 = vld [vmem:[#allocation1 + $0x1] sm:$0x1]   ;;  %v7_v2 = vld [vmem:[#allocation1] sm:$0x1]  }
   0xa   :  { %12 = vrot.lane.b32.xlu0 %v11_v1, %s25_s0  ;;  %9 = vst.msk [vmem:[#allocation0] sm:$0x1] %vm8_vm0, %v7_v2  }
  0x7c   :  { %v13_v3 = vpop.permute.xlu0 %12  }
  0x7d   :  { %15 = vst.msk [vmem:[#allocation0] sm:$0x1] %vm14_vm1, %v13_v3  }
  0x84   :  { %v20_v4 = vld [vmem:[#allocation0] sm:$0x1] }
  0x85   :  { %23 = vst [vmem:[%s43_s1] sm:$0x1] %v20_v4 }

// kernel: categorical_presence.1
= control target key start
LH: loop header
LB: loop body
LE: loop exit
PB: predicated region body
PF: predicated region fallthrough
CT: control target
= control target key end

     0   :  { %s533_s6 = smov 0   ;;  %s535_s7 = smov 0   ;;  %s604_s0 = inlined_call_operand.vmem [shape: f32[2,16,128], index: 0, kind: input, shape index: {}]   ;;  %s605_s1 = inlined_call_operand.vmem [shape: f32[2,8,128], index: 1, kind: output, shape index: {}]  }
   0x1   :  { %s537_s8 = smov 0   ;;  %s539_s9 = smov 0  }
   0x2   :  { %s541_s10 = smov 0  }
   0x3 LB: > { %s23_s11 = sadd.s32 1, %s516_s9  ;;  %p39_p1 = scmp.ne.s32.totalorder %s508_s7, %s504_s6  ;;  %s520_s10 = sphi %s541_s10, %s11_s10   ;;  %s516_s9 = sphi %s539_s9, %s609_s9   ;;  %s512_s8 = sphi %s537_s8, %s608_s8   ;;  %s508_s7 = sphi %s535_s7, %s607_s7   ;;  %s504_s6 = sphi %s533_s6, %s606_s6  }
   0x4   : > { %p25_p0 = scmp.ge.s32.totalorder %s23_s11, 2  ;;  %p40_p2 = scmp.eq.s32.totalorder %s520_s10, 0 }
   0x5   : > { %s32_s13 = sadd.s32 1, %s508_s7  ;;  %p408_p5 = scmp.ge.s32.totalorder %s520_s10, 2 }
   0x6   : > { %s611_s11 = smov (%p25_p0, %s23_s11), 0  ;;  %p41_p3 = por %p40_p2, %p39_p1 }
   0x7   : > { %s29_s12 = ssub.s32 %s516_s9, %s611_s11  ;;  %91 = sbr.rel (%p408_p5) target bundleno = 17 (0x11), region = 16 }
   0x8   : > { %p30_p4 = scmp.eq.s32.totalorder %s29_s12, 0 }
   0xa   : > { %s568_s14 = scalar_select %p30_p4, %s508_s7, %s32_s13  }
   0xc   : > { %94 = sbr.rel (!%p41_p3) target bundleno = 17 (0x11), region = 20  ;;  %s96_s15 = sand.u32 (%p41_p3), 1, %s508_s7  }
   0xd   : > { %s410_s16 = sshll.u32 (%p41_p3), %s516_s9, 3  ;;  %s409_s17 = sshll.u32 (%p41_p3), %s96_s15, 4 }
   0xe   : > { %s101_s20 = scalar_lea.vmem (%p41_p3), %s604_s0, %s410_s16  ;;  %s98_s21 = scalar_lea.vmem (%p41_p3), [#allocation2], %s409_s17 }
   0xf   : > { %v132_v0 = vld [vmem:[%s101_s20] sm:$0xff] (%p41_p3)  ;;  %v134_v1 = vld [vmem:[%s101_s20 + $0x10] sm:$0xff] (%p41_p3) }
  0x10   : > { %133 = vst [vmem:[%s98_s21] sm:$0xff] (%p41_p3), %v132_v0  ;;  %135 = vst [vmem:[%s98_s21 + $0x8] sm:$0xff] (%p41_p3), %v134_v1 }
  0x11 PF: > { %p411_p6 = scmp.ge.s32.totalorder %s520_s10, 1  ;;  %p140_p7 = scmp.lt.s32.totalorder %s520_s10, 3 }
  0x13   : > { %p141_p8 = pnand %p411_p6, %p140_p7 }
  0x14   : > { %s147_s22 = sand.u32 (!%p141_p8), 1, %s504_s6   ;;  %p166_p9 = scmp.lt.s32.totalorder (!%p141_p8), %s512_s8, 1 }
  0x15   : > { %144 = sbr.rel (%p141_p8) target bundleno = 263 (0x107), region = 58  ;;  %s412_s23 = sshll.u32 (!%p141_p8), %s147_s22, 4 }
  0x16   : > { %s149_s24 = scalar_lea.vmem (!%p141_p8), [#allocation2], %s412_s23 }
  0x1a   : > { %v177_v2 = vld [vmem:[%s149_s24] sm:$0xff]  ;;  %v414_v3 = vld [vmem:[%s149_s24 + $0x8] sm:$0xff]  ;;  %v522_v10 = vmov 0.0   ;;  %s613_s8 = smov (!%p166_p9, %s512_s8), 1 }
  0x1b   : > { %v417_v4 = vtrunc.f32 %v177_v2  ;;  %v427_v5 = vtrunc.f32 %v414_v3  ;;  %s413_s6 = sshll.u32 %s613_s8, 3 }
  0x1c   : > { %s169_s15 = scalar_lea.vmem %s605_s1, %s413_s6 }
  0x1d   : > { %v418_v6 = vcvt.f32.s32 %v417_v4  ;;  %v428_v7 = vcvt.f32.s32 %v427_v5 }
  0x1f   : > { %v179_v8 = vadd.s32 1, %v418_v6  ;;  %v243_v9 = vadd.s32 1, %v428_v7 }
  0x21   : > { %vm210_vm0 = vcmp.eq.s32.totalorder %v179_v8, 2  ;;  %vm180_vm1 = vcmp.eq.s32.totalorder %v179_v8, 0  ;;  %vm225_vm2 = vcmp.eq.s32.totalorder %v179_v8, 3  ;;  %vm195_vm3 = vcmp.eq.s32.totalorder %v179_v8, 1 }
  0x22   : > { %v211_v11 = vsel %vm210_vm0, 1.0, %v522_v10  ;;  %v181_v12 = vsel %vm180_vm1, 1.0, %v522_v10  ;;  %v226_v13 = vsel %vm225_vm2, 1.0, %v522_v10  ;;  %v196_v14 = vsel %vm195_vm3, 1.0, %v522_v10 }
  0x23   : > { %212 = vmax.xlane.f32.xlu1 %v211_v11  ;;  %182 = vmax.xlane.f32.xlu0 %v181_v12  ;;  %vm258_vm4 = vcmp.eq.s32.totalorder %v243_v9, 1  ;;  %vm244_vm5 = vcmp.eq.s32.totalorder %v243_v9, 0  ;;  %vm286_vm6 = vcmp.eq.s32.totalorder %v243_v9, 3  ;;  %vm272_vm7 = vcmp.eq.s32.totalorder %v243_v9, 2 }
  0x24   : > { %v259_v15 = vsel %vm258_vm4, 1.0, %v522_v10  ;;  %v245_v16 = vsel %vm244_vm5, 1.0, %v522_v10  ;;  %v287_v17 = vsel %vm286_vm6, 1.0, %v522_v10  ;;  %v273_v18 = vsel %vm272_vm7, 1.0, %v522_v10 }
  0x25   : > { %vm315_vm8 = vcmp.eq.s32.totalorder %v243_v9, 5  ;;  %vm300_vm9 = vcmp.eq.s32.totalorder %v243_v9, 4  ;;  %vm330_vm0 = vcmask 1040384   ;;  %vm332_vm1 = vcmask 1041408  }
  0x26   : > { %v316_v19 = vsel %vm315_vm8, 1.0, %v522_v10  ;;  %v301_v20 = vsel %vm300_vm9, 1.0, %v522_v10 }
  0x27   : > { %227 = vmax.xlane.f32.xlu1 %v226_v13  ;;  %197 = vmax.xlane.f32.xlu0 %v196_v14 }
  0x2b   : > { %260 = vmax.xlane.f32.xlu1 %v259_v15  ;;  %246 = vmax.xlane.f32.xlu0 %v245_v16 }
  0x2f   : > { %288 = vmax.xlane.f32.xlu1 %v287_v17  ;;  %274 = vmax.xlane.f32.xlu0 %v273_v18 }
  0x33   : > { %317 = vmax.xlane.f32.xlu1 %v316_v19  ;;  %302 = vmax.xlane.f32.xlu0 %v301_v20 }
  0xac   : > { %v213_v21 = vpop.xlane.xlu1 %212  ;;  %v183_v22 = vpop.xlane.xlu0 %182 }
  0xad   : > { %v214_v23 = vrot.slane %v213_v21, 4  ;;  %v184_v24 = vrot.slane %v183_v22, 4 }
  0xaf   : > { %v215_v25 = vmax.f32 %v213_v21, %v214_v23  ;;  %v185_v26 = vmax.f32 %v183_v22, %v184_v24 }
  0xb0   : > { %v228_v27 = vpop.xlane.xlu1 %227  ;;  %v198_v28 = vpop.xlane.xlu0 %197 }
  0xb1   : > { %v216_v29 = vrot.slane %v215_v25, 2  ;;  %v186_v30 = vrot.slane %v185_v26, 2  ;;  %v229_v31 = vrot.slane %v228_v27, 4  ;;  %v199_v32 = vrot.slane %v198_v28, 4 }
  0xb3   : > { %v230_v33 = vmax.f32 %v228_v27, %v229_v31  ;;  %v200_v34 = vmax.f32 %v198_v28, %v199_v32  ;;  %v187_v35 = vmax.f32 %v185_v26, %v186_v30  ;;  %v217_v38 = vmax.f32 %v215_v25, %v216_v29 }
  0xb4   : > { %v261_v36 = vpop.xlane.xlu1 %260  ;;  %v247_v37 = vpop.xlane.xlu0 %246  ;;  %v175_v27 = vlaneseq }
  0xb5   : > { %v231_v39 = vrot.slane %v230_v33, 2  ;;  %v201_v40 = vrot.slane %v200_v34, 2  ;;  %v262_v41 = vrot.slane %v261_v36, 4  ;;  %v248_v42 = vrot.slane %v247_v37, 4 }
  0xb6   : > { %v188_v43 = vrot.slane %v187_v35, 1  ;;  %v218_v51 = vrot.slane %v217_v38, 1  ;;  %v176_v28 = vand.u32 127, %v175_v27 }
  0xb7   : > { %v263_v44 = vmax.f32 %v261_v36, %v262_v41  ;;  %v249_v45 = vmax.f32 %v247_v37, %v248_v42  ;;  %v202_v46 = vmax.f32 %v200_v34, %v201_v40  ;;  %v232_v47 = vmax.f32 %v230_v33, %v231_v39 }
  0xb8   : > { %v289_v48 = vpop.xlane.xlu1 %288  ;;  %v275_v49 = vpop.xlane.xlu0 %274  ;;  %v189_v50 = vmax.f32 %v187_v35, %v188_v43  ;;  %v219_v1 = vmax.f32 %v217_v38, %v218_v51  ;;  %vm191_vm10 = vcmp.eq.s32.totalorder %v176_v28, 0  ;;  %vm206_vm11 = vcmp.eq.s32.totalorder %v176_v28, 1 }
  0xb9   : > { %v264_v52 = vrot.slane %v263_v44, 2  ;;  %v250_v53 = vrot.slane %v249_v45, 2  ;;  %v290_v54 = vrot.slane %v289_v48, 4  ;;  %v276_v55 = vrot.slane %v275_v49, 4 }
  0xba   : > { %419 = vpush %v189_v50  ;;  %v203_v56 = vrot.slane %v202_v46, 1  ;;  %v233_v57 = vrot.slane %v232_v47, 1  ;;  %vm221_vm12 = vcmp.eq.s32.totalorder %v176_v28, 2  ;;  %vm311_vm13 = vcmp.eq.s32.totalorder %v176_v28, 4 }
  0xbb   : > { %v291_v58 = vmax.f32 %v289_v48, %v290_v54  ;;  %v277_v59 = vmax.f32 %v275_v49, %v276_v55  ;;  %v251_v60 = vmax.f32 %v249_v45, %v250_v53  ;;  %v265_v61 = vmax.f32 %v263_v44, %v264_v52 }
  0xbc   : > { %v318_v62 = vpop.xlane.xlu1 %317  ;;  %v303_v63 = vpop.xlane.xlu0 %302  ;;  %v204_v0 = vmax.f32 %v202_v46, %v203_v56  ;;  %v234_v2 = vmax.f32 %v232_v47, %v233_v57  ;;  %vm236_vm14 = vcmp.eq.s32.totalorder %v176_v28, 3  ;;  %vm326_vm15 = vcmp.eq.s32.totalorder %v176_v28, 5 }
  0xbd   : > { %v292_v3 = vrot.slane %v291_v58, 2  ;;  %v278_v4 = vrot.slane %v277_v59, 2  ;;  %v319_v5 = vrot.slane %v318_v62, 4  ;;  %v304_v6 = vrot.slane %v303_v63, 4 }
  0xbe   : > { %421 = vpush %v204_v0  ;;  %v252_v7 = vrot.slane %v251_v60, 1  ;;  %v266_v8 = vrot.slane %v265_v61, 1 }
  0xbf   : > { %v320_v9 = vmax.f32 %v318_v62, %v319_v5  ;;  %v305_v10 = vmax.f32 %v303_v63, %v304_v6  ;;  %423 = vpush %v219_v1  ;;  %v279_v11 = vmax.f32 %v277_v59, %v278_v4  ;;  %v293_v12 = vmax.f32 %v291_v58, %v292_v3 }
  0xc0   : > { %425 = vpush %v234_v2  ;;  %v253_v13 = vmax.f32 %v251_v60, %v252_v7  ;;  %v267_v14 = vmax.f32 %v265_v61, %v266_v8 }
  0xc1   : > { %v321_v15 = vrot.slane %v320_v9, 2  ;;  %v306_v16 = vrot.slane %v305_v10, 2  ;;  %v280_v17 = vrot.slane %v279_v11, 1  ;;  %v294_v18 = vrot.slane %v293_v12, 1 }
  0xc2   : > { %429 = vpush %v253_v13 }
  0xc3   : > { %v322_v19 = vmax.f32 %v320_v9, %v321_v15  ;;  %v307_v20 = vmax.f32 %v305_v10, %v306_v16  ;;  %431 = vpush %v267_v14  ;;  %v281_v21 = vmax.f32 %v279_v11, %v280_v17  ;;  %v295_v22 = vmax.f32 %v293_v12, %v294_v18 }
  0xc5   : > { %433 = vpush %v281_v21  ;;  %v308_v23 = vrot.slane %v307_v20, 1  ;;  %v323_v24 = vrot.slane %v322_v19, 1 }
  0xc6   : > { %435 = vpush %v295_v22 }
  0xc7   : > { %v309_v25 = vmax.f32 %v307_v20, %v308_v23  ;;  %v324_v26 = vmax.f32 %v322_v19, %v323_v24 }
  0xc9   : > { %437 = vpush %v309_v25 }
  0xca   : > { %439 = vpush %v324_v26 }
  0xeb   : > { %s420_s25 = spop %419 }
  0xec   : > { %v192_v29 = vstv %s420_s25 }
  0xed   : > { %v193_v31 = vsel %vm191_vm10, %v192_v29, 0.0 }
  0xee   : > { %v194_v36 = vmax.f32 %v193_v31, 0.0 }
  0xef   : > { %s422_s26 = spop %421 }
  0xf0   : > { %s424_s27 = spop %423  ;;  %v207_v30 = vstv %s422_s26 }
  0xf1   : > { %s579_s28 = spop %425  ;;  %v208_v33 = vsel %vm206_vm11, %v207_v30, 0.0  ;;  %v222_v38 = vstv %s424_s27 }
  0xf2   : > { %v209_v41 = vmax.f32 %v194_v36, %v208_v33  ;;  %v223_v46 = vsel %vm221_vm12, %v222_v38, 0.0  ;;  %v237_v47 = vstv %s579_s28 }
  0xf3   : > { %s430_s29 = spop %429  ;;  %v238_v55 = vsel %vm236_vm14, %v237_v47, 0.0 }
  0xf4   : > { %v255_v32 = vstv %s430_s29  ;;  %s432_s30 = spop %431  ;;  %v224_v50 = vmax.f32 %v209_v41, %v223_v46 }
  0xf5   : > { %v256_v34 = vsel %vm191_vm10, %v255_v32, 0.0  ;;  %v269_v35 = vstv %s432_s30 }
  0xf6   : > { %v257_v37 = vmax.f32 %v256_v34, 0.0  ;;  %s434_s2 = spop %433  ;;  %v270_v39 = vsel %vm206_vm11, %v269_v35, 0.0  ;;  %v239_v57 = vmax.f32 %v224_v50, %v238_v55 }
  0xf7   : > { %v283_v40 = vstv %s434_s2  ;;  %s436_s3 = spop %435 }
  0xf8   : > { %v271_v42 = vmax.f32 %v257_v37, %v270_v39  ;;  %v284_v43 = vsel %vm221_vm12, %v283_v40, 0.0  ;;  %v297_v44 = vstv %s436_s3 }
  0xf9   : > { %v298_v48 = vsel %vm236_vm14, %v297_v44, 0.0 }
  0xfa   : > { %v285_v45 = vmax.f32 %v271_v42, %v284_v43  ;;  %s438_s4 = spop %437 }
  0xfb   : > { %v312_v49 = vstv %s438_s4  ;;  %s440_s5 = spop %439 }
  0xfc   : > { %v299_v51 = vmax.f32 %v285_v45, %v298_v48  ;;  %v313_v52 = vsel %vm311_vm13, %v312_v49, 0.0  ;;  %v327_v53 = vstv %s440_s5 }
  0xfd   : > { %v328_v56 = vsel %vm326_vm15, %v327_v53, 0.0 }
  0xfe   : > { %v314_v54 = vmax.f32 %v299_v51, %v313_v52 }
 0x100   : > { %v329_v58 = vmax.f32 %v314_v54, %v328_v56 }
 0x102   : > { %v331_v59 = vsel %vm330_vm0, %v239_v57, %v329_v58 }
 0x103   : > { %v333_v60 = vsel %vm332_vm1, %v331_v59, 0.0 }
 0x104   : > { %v335_v61 = vmax.f32 %v333_v60, 0.0 }
 0x106   : > { %336 = vst [vmem:[%s169_s15] sm:$0xff] %v335_v61 }
 0x107 PF: > { %s11_s10 = sadd.s32 1, %s520_s10   ;;  %s606_s6 = smov %s508_s7 }
 0x108   : > { %p8_p10 = scmp.ge.s32.totalorder %s11_s10, 4   ;;  %s607_s7 = smov %s568_s14 }
 0x109   : > { %s608_s8 = smov %s516_s9  ;;  %s609_s9 = smov %s611_s11 }
 0x10a   :  { %10 = sbr.rel (!%p8_p10) target bundleno = 3 (0x3), region = 102 }

</bundles_post_ra>
